<compile_context>
chip_gen: v6e
topology: v6e:2x2x1
jax: 0.10.0
libtpu: 0.0.40
codegen_flags: <defaults>
</compile_context>

<pallas_src>
import functools

import jax
import jax.numpy as jnp
from jax.experimental import pallas as pl
from jax.experimental.pallas import tpu as pltpu


_HBM_GATHER_SLOTS = 16     # outstanding row DMAs in the HBM-gather path
_STATIC_UNROLL_MAX = 64    # fully unroll per-block token loops up to this size
_ONEHOT_MAX_VOCAB = 4096   # one-hot MXU gather only below this vocab size


def _vmem_capacity_bytes() -> int:
    """Per-TensorCore VMEM capacity, with a conservative (v7x) fallback."""
    try:
        cap = getattr(pltpu.get_tpu_info(), "vmem_capacity_bytes", None)
        if cap:
            return int(cap)
    except Exception:
        pass
    return 64 << 20


def _pick_seq_tile(seq, batch, bytes_per_token, row_align, *,
                   max_tokens, max_block_bytes, min_blocks=2):
    """Largest divisor t of `seq` whose (t*batch)-token block is row-aligned
    (or covers the whole sequence) and fits the token/byte budget; prefer
    leaving at least `min_blocks` grid steps (v7x megacore + pipelining)."""
    def ok(t):
        tb = t * batch
        if tb > max_tokens or tb * bytes_per_token > max_block_bytes:
            return False
        return tb % row_align == 0 or t == seq

    cand = [t for t in range(1, seq + 1) if seq % t == 0 and ok(t)]
    if not cand:
        return 1
    pref = [t for t in cand if seq // t >= min_blocks]
    return max(pref) if pref else max(cand)


def _embedding_onehot_kernel(ids_ref, table_ref, out_ref):
    # ids_ref  : (tokens_per_block, 1) int32, already clipped, output row order
    # table_ref: (vocab, hidden) embedding table resident in VMEM
    # out_ref  : (tokens_per_block, hidden) dense output block
    tb = out_ref.shape[0]
    vocab = table_ref.shape[0]
    tok = ids_ref[...]                                           # (tb, 1)
    iota_v = jax.lax.broadcasted_iota(jnp.int32, (tb, vocab), 1)
    onehot = (tok == iota_v).astype(table_ref.dtype)             # (tb, vocab)
    # Exact row selection on the MXU (0/1 weights, f32 accumulation) with a
    # single fully dense (tb, hidden) store — no masked per-row vst traffic.
    out_ref[...] = jnp.dot(
        onehot, table_ref[...], preferred_element_type=jnp.float32
    ).astype(out_ref.dtype)


def _embedding_hbm_kernel(ids_ref, table_hbm, out_ref, sem, *, n_slots):
    # ids_ref  : (seq*batch,) int32 in SMEM (scalar prefetch, clipped, row order)
    # table_hbm: (vocab, hidden_k) table left in HBM (possibly uint32-packed)
    # out_ref  : (tokens_per_block, hidden_k) VMEM output block
    # sem      : (n_slots,) DMA semaphores — sliding window of row gathers
    j = pl.program_id(0)
    tb = out_ref.shape[0]
    base = j * tb

    def issue(r, tok):
        pltpu.make_async_copy(
            table_hbm.at[tok], out_ref.at[r], sem.at[r % n_slots]).start()

    def wait_row(r):
        # Dummy src (.at[0]); only dst shape/dtype + semaphore matter for wait.
        pltpu.make_async_copy(
            table_hbm.at[0], out_ref.at[r], sem.at[r % n_slots]).wait()

    if tb <= _STATIC_UNROLL_MAX:
        for r in range(tb):
            tok = ids_ref[base + r]          # read id BEFORE any wait (SMEM fwd)
            if r >= n_slots:
                wait_row(r - n_slots)
            issue(r, tok)
        for r in range(max(tb - n_slots, 0), tb):
            wait_row(r)
    else:
        for r in range(n_slots):             # prime the DMA window
            issue(r, ids_ref[base + r])

        def steady(r, carry):
            tok = ids_ref[base + r]           # hoisted above the wait
            wait_row(r - n_slots)
            issue(r, tok)
            return carry

        jax.lax.fori_loop(n_slots, tb, steady, 0, unroll=8)

        def drain(r, carry):
            wait_row(r)
            return carry

        jax.lax.fori_loop(tb - n_slots, tb, drain, 0, unroll=8)


def chatglm_embedding(input_ids, table, *, force_hbm_gather=False):
    """ChatGLM2 `Embedding` forward.

    Args:
      input_ids: int array [batch, seq]
      table:     [padded_vocab, hidden] embedding weight
    Returns:
      [seq, batch, hidden] array in table.dtype
    """
    batch, seq = input_ids.shape
    vocab, hidden = table.shape
    itemsize = jnp.dtype(table.dtype).itemsize
    n_tok = batch * seq

    # Fused transpose(0, 1): flat output row for token (b, s) is s*batch + b.
    # Clip once here so the kernels do no per-row clamp.
    # TODO(synk): torch.nn.Embedding raises on out-of-range ids; we clamp.
    ids_flat = jnp.clip(input_ids.astype(jnp.int32).T.reshape(-1), 0, vocab - 1)

    # Generation-aware budgets (v7x: 64 MiB VMEM/TC; v5e/v6e: 128 MiB).
    vmem_cap = _vmem_capacity_bytes()
    big_vmem = vmem_cap >= (96 << 20)
    vmem_hard_cap = (64 << 20) if big_vmem else (44 << 20)
    max_tokens = 2048 if big_vmem else 512
    max_block_bytes = (16 << 20) if big_vmem else (8 << 20)
    onehot_table_budget = (24 << 20) if big_vmem else (12 << 20)

    table_bytes = vocab * hidden * itemsize
    use_onehot = (not force_hbm_gather
                  and vocab <= _ONEHOT_MAX_VOCAB
                  and 2 * table_bytes <= onehot_table_budget)  # table double-buffered

    if use_onehot:
        # ---- Small-vocab path: VMEM-resident table, dense one-hot MXU gather.
        row_align = max(8, 32 // itemsize)            # 8 f32 / 16 bf16 / 32 int8
        bytes_per_token = hidden * itemsize + vocab * 4   # out row + onehot row
        budget_left = max(vmem_hard_cap - 2 * table_bytes - (4 << 20), 3 << 20)
        eff_max_block = min(max_block_bytes, budget_left // 3)
        seq_tile = _pick_seq_tile(seq, batch, bytes_per_token, row_align,
                                  max_tokens=max_tokens,
                                  max_block_bytes=eff_max_block)
        tb = seq_tile * batch
        n_blocks = seq // seq_tile
        ids_col = ids_flat.reshape(n_tok, 1)

        vmem_needed = 2 * table_bytes + 3 * tb * bytes_per_token + (2 << 20)
        grid_spec = pltpu.PrefetchScalarGridSpec(
            num_scalar_prefetch=0,
            grid=(n_blocks,),
            in_specs=[pl.BlockSpec((tb, 1), lambda j: (j, 0)),
                      pl.BlockSpec((vocab, hidden), lambda j: (0, 0))],
            out_specs=pl.BlockSpec((tb, hidden), lambda j: (j, 0)),
        )
        cost = pl.CostEstimate(
            flops=2 * n_tok * vocab * hidden, transcendentals=0,
            bytes_accessed=int(table_bytes + n_tok * hidden * itemsize + n_tok * 4))
        out_flat = pl.pallas_call(
            _embedding_onehot_kernel,
            out_shape=jax.ShapeDtypeStruct((n_tok, hidden), table.dtype),
            grid_spec=grid_spec,
            compiler_params=pltpu.CompilerParams(
                dimension_semantics=("parallel",),
                vmem_limit_bytes=int(min(max(vmem_needed, 16 << 20), vmem_hard_cap))),
            cost_estimate=cost,
        )(ids_col, table)
        return out_flat.reshape(seq, batch, hidden)

    # ---- General path: table in HBM, one row DMA per token (sliding window).
    # Sub-32-bit tables are viewed as packed uint32 rows so every row DMA moves
    # whole 32-bit words (dense descriptors + dense VMEM writes).
    # TODO(synk): for a jitted model, pre-pack the weights to uint32 once
    # outside this call so XLA does not re-layout the table every forward.
    pack = 1
    if itemsize < 4 and hidden % (4 // itemsize) == 0:
        pack = 4 // itemsize
    if pack > 1:
        table_k = jax.lax.bitcast_convert_type(
            table.reshape(vocab, hidden // pack, pack), jnp.uint32)
        kdtype, hidden_k, k_itemsize = jnp.uint32, hidden // pack, 4
    else:
        table_k, kdtype, hidden_k, k_itemsize = table, table.dtype, hidden, itemsize

    row_align = max(8, 32 // k_itemsize)
    seq_tile = _pick_seq_tile(seq, batch, hidden_k * k_itemsize, row_align,
                              max_tokens=max_tokens,
                              max_block_bytes=max_block_bytes)
    tb = seq_tile * batch
    n_blocks = seq // seq_tile
    out_block_bytes = tb * hidden_k * k_itemsize
    vmem_needed = 3 * out_block_bytes + (2 << 20)

    grid_spec = pltpu.PrefetchScalarGridSpec(
        num_scalar_prefetch=1,
        grid=(n_blocks,),
        in_specs=[pl.BlockSpec(memory_space=pl.ANY)],
        out_specs=pl.BlockSpec((tb, hidden_k), lambda j, ids: (j, 0)),
        scratch_shapes=[pltpu.SemaphoreType.DMA((_HBM_GATHER_SLOTS,))],
    )
    cost = pl.CostEstimate(
        flops=0, transcendentals=0,
        bytes_accessed=int(2 * n_tok * hidden * itemsize + n_tok * 4))
    out_flat = pl.pallas_call(
        functools.partial(_embedding_hbm_kernel, n_slots=_HBM_GATHER_SLOTS),
        out_shape=jax.ShapeDtypeStruct((n_tok, hidden_k), kdtype),
        grid_spec=grid_spec,
        compiler_params=pltpu.CompilerParams(
            dimension_semantics=("parallel",),
            vmem_limit_bytes=int(min(max(vmem_needed, 16 << 20), vmem_hard_cap))),
        cost_estimate=cost,
    )(ids_flat, table_k)

    if pack > 1:
        out_flat = jax.lax.bitcast_convert_type(out_flat, table.dtype)
    return out_flat.reshape(seq, batch, hidden)


def _reference(input_ids, table):
    # torch: word_embeddings(input_ids).transpose(0, 1)
    return jnp.take(table, input_ids, axis=0).transpose(1, 0, 2)


if __name__ == "__main__":
    key = jax.random.PRNGKey(0)
    k_tbl, k_ids, k_tbl2, k_ids2 = jax.random.split(key, 4)

    # Small synthetic config consistent with the module's __init__:
    #   padded_vocab_size=64, hidden_size=128, dtype=bfloat16
    BATCH, SEQ, VOCAB, HIDDEN = 2, 8, 64, 128
    table = jax.random.normal(k_tbl, (VOCAB, HIDDEN), jnp.float32).astype(jnp.bfloat16)
    input_ids = jax.random.randint(k_ids, (BATCH, SEQ), 0, VOCAB, dtype=jnp.int32)
    ref_bf16 = _reference(input_ids, table)

    checks = []

    # 1) Default (small vocab): VMEM-resident table, one-hot MXU gather path.
    out1 = jax.block_until_ready(chatglm_embedding(input_ids, table))
    checks.append(("onehot_vmem", out1, ref_bf16, jnp.bfloat16))

    # 2) Forced HBM row-DMA gather path with uint32-packed bf16 rows.
    out2 = jax.block_until_ready(
        chatglm_embedding(input_ids, table, force_hbm_gather=True))
    checks.append(("hbm_packed", out2, ref_bf16, jnp.bfloat16))

    # 3) f32 table, odd batch/seq: HBM path, no packing, single ragged block.
    table32 = jax.random.normal(k_tbl2, (VOCAB, HIDDEN), jnp.float32)
    ids_odd = jax.random.randint(k_ids2, (3, 5), 0, VOCAB, dtype=jnp.int32)
    out3 = jax.block_until_ready(
        chatglm_embedding(ids_odd, table32, force_hbm_gather=True))
    checks.append(("hbm_f32_odd", out3, _reference(ids_odd, table32), jnp.float32))

    for name, out, ref, dt in checks:
        assert out.shape == ref.shape, (name, out.shape, ref.shape)
        assert out.dtype == dt, (name, out.dtype)
        assert jnp.array_equal(out.astype(jnp.float32), ref.astype(jnp.float32)), \
            f"{name}: mismatch vs reference gather"

    print("KERNEL_OK")
</pallas_src>

<mosaic_0001>
module attributes {stable_mosaic.version = 11 : i64} {
  func.func @_embedding_onehot_kernel(%arg0: i32, %arg1: memref<16x1xi32, #tpu.memory_space<vmem>>, %arg2: memref<64x128xbf16, #tpu.memory_space<vmem>>, %arg3: memref<16x128xbf16, #tpu.memory_space<vmem>>) attributes {dimension_semantics = [#tpu.dimension_semantics<parallel>], iteration_bounds = array<i64: 1>, scalar_prefetch = 0 : i64, scratch_operands = 0 : i64, tpu.core_type = #tpu.core_type<tc>, window_params = [{transform_indices = @transform_0, window_bounds = array<i64: 16, 1>}, {pipeline_mode = #tpu.pipeline_mode<synchronous>, transform_indices = @transform_1, window_bounds = array<i64: 64, 128>}, {transform_indices = @transform_2, window_bounds = array<i64: 16, 128>}]} {
    %c0 = arith.constant 0 : index
    %c0_0 = arith.constant 0 : index
    %0 = vector.load %arg1[%c0, %c0_0] : memref<16x1xi32, #tpu.memory_space<vmem>>, vector<16x1xi32>
    %1 = tpu.iota {dimensions = array<i32: 1>} : vector<16x64xi32>
    %2 = vector.broadcast %0 : vector<16x1xi32> to vector<16x64xi32>
    %3 = arith.cmpi eq, %2, %1 : vector<16x64xi32>
    %4 = arith.extui %3 : vector<16x64xi1> to vector<16x64xi32>
    %5 = arith.sitofp %4 : vector<16x64xi32> to vector<16x64xf32>
    %6 = arith.truncf %5 : vector<16x64xf32> to vector<16x64xbf16>
    %c0_1 = arith.constant 0 : index
    %c0_2 = arith.constant 0 : index
    %7 = vector.load %arg2[%c0_1, %c0_2] : memref<64x128xbf16, #tpu.memory_space<vmem>>, vector<64x128xbf16>
    %cst = arith.constant dense<0.000000e+00> : vector<16x128xf32>
    %8 = tpu.matmul %6, %7, %cst {dimension_numbers = #tpu.dot_dimension_numbers<[1], [0], [0], [1], [0, 0, 1, 1], [], []>} : vector<16x64xbf16>, vector<64x128xbf16>, vector<16x128xf32> -> vector<16x128xf32>
    %9 = arith.truncf %8 : vector<16x128xf32> to vector<16x128xbf16>
    %c0_3 = arith.constant 0 : index
    %c0_4 = arith.constant 0 : index
    %10 = vector.load %arg3[%c0_3, %c0_4] : memref<16x128xbf16, #tpu.memory_space<vmem>>, vector<16x128xbf16>
    tpu.vector_store %arg3[%c0_3, %c0_4], %9 {strides = array<i32>} : memref<16x128xbf16, #tpu.memory_space<vmem>>, vector<16x128xbf16>,
    return
  }
  func.func @transform_0(%arg0: i32) -> (i32, i32) {
    %c0_i32 = arith.constant 0 : i32
    %c0_i32_0 = arith.constant 0 : i32
    return %arg0, %c0_i32 : i32, i32
  }
  func.func @transform_1(%arg0: i32) -> (i32, i32) {
    %c0_i32 = arith.constant 0 : i32
    %c0_i32_0 = arith.constant 0 : i32
    %c0_i32_1 = arith.constant 0 : i32
    return %c0_i32, %c0_i32_0 : i32, i32
  }
  func.func @transform_2(%arg0: i32) -> (i32, i32) {
    %c0_i32 = arith.constant 0 : i32
    %c0_i32_0 = arith.constant 0 : i32
    return %arg0, %c0_i32 : i32, i32
  }
}

</mosaic_0001>

<bundles_post_ra>
// kernel: tpu_custom_call.1
= control target key start
LH: loop header
LB: loop body
LE: loop exit
PB: predicated region body
PF: predicated region fallthrough
CT: control target
= control target key end

     0   :  { %7 = vsyncpa [#allocation3], 0  ;;  %s277_s0 = inlined_call_operand.vmem [shape: s32[16,1], index: 0, kind: input, shape index: {}]   ;;  %s278_s1 = inlined_call_operand.hbm [shape: bf16[64,128], index: 1, kind: input, shape index: {}]   ;;  %s279_s2 = inlined_call_operand.hbm [shape: bf16[16,128], index: 2, kind: output, shape index: {}]  }
   0x1   :  { %8 = vsyncpa [#allocation4], 0  ;;  %s237_s9 = smov [#allocation2]  }
   0x2   :  { %s16_s10 = sshll.u32 %s237_s9, 4  ;;  %s17_s10 = int_to_ptr.vmem [resolvable:$true] %s16_s10 }
   0x3   :  { %s201_s11 = scalar_lea.vmem %s17_s10, 512  ;;  %p206_p1 = scmp.lt.s32.totalorder %s17_s10, %s17_s10 }
   0x4   :  { %p202_p0 = scmp.ne.s32.totalorder %s17_s10, %s201_s11  ;;  %p207_p2 = scmp.lt.s32.totalorder %s201_s11, %s201_s11 }
   0x6   :  { %p208_p3 = por %p207_p2, %p206_p1 }
   0x8   :  { %p209_p4 = pnand %p208_p3, %p202_p0 }
   0xa   :  { %212 = shalt.err (!%p209_p4)
}
   0xb   :  { %s238_s12 = smov 64   ;;  %s239_s13 = smov 4  }
   0xc   :  { %22 = dma.hbm_to_vmem [thread:$0]  %s278_s1, 512, %s17_s10, [#allocation3], %s238_s12, %s238_s12, %s239_s13  }
   0xd   :  { %233 = dma.done.wait [#allocation3], 512  }
   0xe   :  { %234 = vsyncadd [#allocation3], 4294966784  ;;  %v240_v0 = vmov 0   ;;  %v241_v1 = vmov 0.0   ;;  %v27_v2 = vld [vmem:[%s277_s0] sm:$0xff]  ;;  %v189_v3 = vld [vmem:[#allocation2 + $0x18] sm:$0xff]   ;;  %v29_v8 = vlaneseq }
   0xf   :  { %188 = vset.pattern.permute.xlu0 %v240_v0  ;;  %169 = vmatprep.subr.bf16.mxu0 %v241_v1  ;;  %v28_v4 = vld [vmem:[%s277_s0 + $0x8] sm:$0xff]  ;;  %v190_v5 = vld [vmem:[#allocation2 + $0x10] sm:$0xff]   ;;  %vm242_vm0 = vmmov 0   ;;  %v192_v7 = vld [vmem:[#allocation2] sm:$0xff]   ;;  %vm76_vm3 = vcmask 523264   ;;  %s243_s0 = smov [#allocation5]  }
  0x10   :  { %32 = vperm.xlu0 %188, %v27_v2   ;;  %170 = vmatpush3.bf16.msra.mxu0 %v189_v3  ;;  %v191_v6 = vld [vmem:[#allocation2 + $0x8] sm:$0xff]   ;;  %v30_v9 = vand.u32 127, %v29_v8  ;;  %s136_s1 = sshll.u32 %s243_s0, 4  ;;  %s137_s1 = int_to_ptr.vmem [resolvable:$true] %s136_s1 }
  0x11   :  { %171 = vmatprep.subr.bf16.mxu0 %v241_v1  ;;  %177 = vmatprep.mubr.msk.bf16.mxu0 %vm242_vm0, %v241_v1  ;;  %s213_s20 = scalar_lea.vmem %s137_s1, 128  ;;  %p218_p6 = scmp.lt.s32.totalorder %s137_s1, %s137_s1 }
  0x12   :  { %p214_p5 = scmp.ne.s32.totalorder %s137_s1, %s213_s20  ;;  %p219_p7 = scmp.lt.s32.totalorder %s213_s20, %s213_s20 }
  0x14   :  { %35 = vperm.xlu0 %188, %v28_v4   ;;  %172 = vmatpush3.bf16.msra.mxu0 %v190_v5  ;;  %p220_p8 = por %p219_p7, %p218_p6 }
  0x15   :  { %173 = vmatprep.subr.bf16.mxu0 %v241_v1 }
  0x16   :  { %p221_p9 = pnand %p220_p8, %p214_p5 }
  0x18   :  { %174 = vmatpush3.bf16.msra.mxu0 %v191_v6 }
  0x19   :  { %175 = vmatprep.subr.bf16.mxu0 %v241_v1 }
  0x1c   :  { %176 = vmatpush3.bf16.msra.mxu0 %v192_v7 }
  0x8b   :  { %v33_v10 = vpop.permute.xlu0 %32 }
  0x8c   :  { %vm37_vm1 = vcmp.eq.s32.totalorder %v33_v10, %v30_v9 }
  0x8d   :  { %v148_v12 = vsel %vm37_vm1, 1.0, %v241_v1 }
  0x8f   :  { %v36_v11 = vpop.permute.xlu0 %35 }
  0x90   :  { %vm38_vm2 = vcmp.eq.s32.totalorder %v36_v11, %v30_v9 }
  0x91   :  { %v149_v13 = vsel %vm38_vm2, 1.0, %v241_v1 }
  0x92   :  { %v43_v14 = vpack.c.bf16 %v149_v13, %v148_v12 }
  0x94   :  { %178 = vmatmul.mubr.msk.bf16.vlgmr.msra.gmra.mxu0 %vm76_vm3, %v43_v14 }
 0x154   :  { %v114_v15 = vpop.f32.mrf.mxu0 }
 0x156   :  { %v179_v16 = vpop.f32.mrf.mxu0 }
 0x158   :  { %v117_v17 = vpop.f32.mrf.mxu0 }
 0x159   :  { %v162_v18 = vpack.c.bf16 %v117_v17, %v114_v15 }
 0x15a   :  { %v180_v19 = vpop.f32.mrf.mxu0 }
 0x15b   :  { %163 = vst [vmem:[#allocation5] sm:$0xff] %v162_v18  }
 0x15c   :  { %224 = shalt.err (!%p221_p9)
}
 0x15d   :  { %142 = dma.vmem_to_hbm [thread:$0]  %s137_s1, 128, %s279_s2, [#allocation4], %s238_s12, %s238_s12, %s239_s13  }
 0x15e   :  { %235 = dma.done.wait [#allocation4], 128  }
 0x15f   :  { %236 = vsyncadd [#allocation4], 4294967168 }
 0x160   :  { %146 = vsyncpa [#allocation3], 1 }
 0x161   :  { %147 = vsyncpa [#allocation4], 1 }

</bundles_post_ra>
